<compile_context>
chip_gen: v7x
topology: tpu7x:2x2x1
jax: 0.10.0
libtpu: 0.0.40
codegen_flags: <defaults>
</compile_context>

<pallas_src>
import functools

import jax
import jax.numpy as jnp
from jax.experimental import pallas as pl
from jax.experimental.pallas import tpu as pltpu

BN_EPS = 1e-5
HIDDEN = 64


def _round_up(n, m):
    return ((n + m - 1) // m) * m


def _vmem_capacity_bytes():
    try:
        return int(pltpu.get_tpu_info().vmem_capacity_bytes)
    except Exception:
        return 64 * 1024 * 1024  # conservative fallback: v7x per-core physical VMEM


def _discriminator_kernel(x_ref, w1_ref, b1_ref, w2_ref, gamma_ref, beta_ref,
                          w3rows_ref, b3_ref, o_ref, sum_ref, sumsq_ref, h2c_ref,
                          *, batch, tile_rows, cache_h2):
    phase = pl.program_id(0)   # 0: accumulate BN stats (+ cache h2), 1: normalize+project
    tile = pl.program_id(1)    # batch-tile index

    def compute_h2():
        x = x_ref[...]                                                    # [TB, L] (bf16/f32)
        h1 = jnp.dot(x, w1_ref[...], preferred_element_type=jnp.float32) + b1_ref[...]
        h1 = jnp.maximum(h1, 0.0)                                         # [TB, 64] f32
        # dis_2 bias intentionally omitted: it cancels exactly under batch-stat BN.
        return jnp.dot(h1.astype(w2_ref.dtype), w2_ref[...],
                       preferred_element_type=jnp.float32)                # [TB, 64] f32

    @pl.when(phase == 0)
    def _accumulate():
        @pl.when(tile == 0)
        def _init():
            sum_ref[...] = jnp.zeros_like(sum_ref)
            sumsq_ref[...] = jnp.zeros_like(sumsq_ref)

        h2 = compute_h2()
        if cache_h2:
            h2c_ref[tile] = h2            # persist h2 for phase 1 (skip second x pass)

        # Mask rows that are pure padding (batch rounded up to a multiple of TB).
        row_ids = tile * tile_rows + jax.lax.broadcasted_iota(
            jnp.int32, (tile_rows, 1), 0)
        h2v = jnp.where(row_ids < batch, h2, 0.0)
        sum_ref[...] += jnp.sum(h2v, axis=0, keepdims=True)
        sumsq_ref[...] += jnp.sum(h2v * h2v, axis=0, keepdims=True)

    @pl.when(phase == 1)
    def _finalize():
        h2 = h2c_ref[tile] if cache_h2 else compute_h2()
        inv_b = 1.0 / batch
        mean = sum_ref[...] * inv_b                                       # [1, 64]
        var = jnp.maximum(sumsq_ref[...] * inv_b - mean * mean, 0.0)      # clamp >= 0
        scale = jax.lax.rsqrt(var + BN_EPS) * gamma_ref[...]              # fused gamma
        shift = beta_ref[...] - mean * scale
        bn = jnp.maximum(h2 * scale + shift, 0.0)                         # [TB, 64] f32
        # dis_3 as a lane-dense row: (8,64) @ (TB,64)^T -> (8,TB); all rows identical.
        proj = jax.lax.dot_general(
            w3rows_ref[...], bn, (((1,), (1,)), ((), ())),
            preferred_element_type=jnp.float32,
            precision=jax.lax.Precision.HIGHEST)
        o_ref[0] = (proj[0:1, :] + b3_ref[...]).astype(o_ref.dtype)       # (1, TB)


def discriminator_forward(x, params, *, tile_rows=4096,
                          compute_dtype=jnp.bfloat16, use_h2_cache=None):
    """x: [B, latent_space]; params = (w1, b1, w2, b2, w3, b3, gamma, beta)."""
    w1, b1, w2, b2, w3, b3, gamma, beta = params
    del b2  # no-op under training-mode BatchNorm (must be restored for eval-mode BN)

    B, L = x.shape
    H = w1.shape[1]
    compute_dtype = jnp.dtype(compute_dtype)
    row_align = 16 if compute_dtype.itemsize < 4 else 8

    TB = min(_round_up(tile_rows, row_align), _round_up(B, row_align))
    B_pad = _round_up(B, TB)
    num_tiles = B_pad // TB
    if B_pad != B:
        x = jnp.pad(x, ((0, B_pad - B), (0, 0)))

    # Streamed operands in compute_dtype; BN / bias / projection params stay f32.
    x = x.astype(compute_dtype)
    w1c = jnp.asarray(w1).astype(compute_dtype)
    w2c = jnp.asarray(w2).astype(compute_dtype)
    b1v = jnp.asarray(b1, jnp.float32).reshape(1, H)
    gammav = jnp.asarray(gamma, jnp.float32).reshape(1, H)
    betav = jnp.asarray(beta, jnp.float32).reshape(1, H)
    b3v = jnp.asarray(b3, jnp.float32).reshape(1, 1)
    # dis_3 weight replicated to 8 sublanes so the lane-dense projection has M=8.
    w3rows = jnp.tile(jnp.asarray(w3, jnp.float32).reshape(1, H), (8, 1))

    # --- Generation-aware VMEM budget and h2-cache gating ------------------------
    phys = _vmem_capacity_bytes()
    vmem_limit = int(min(phys * 3 // 4, 100 * 1024 * 1024))   # ~96 MiB v5e/v6e, ~48 MiB v7x
    x_item = compute_dtype.itemsize
    resident = (2 * TB * L * x_item                            # double-buffered x tile
                + 2 * TB * 4                                   # double-buffered output row
                + 2 * (L * H * x_item + H * H * x_item + 16 * H * 4)  # resident weights
                + 8 * 1024 * 1024)                             # spill / compiler headroom
    cache_bytes = B_pad * H * 4
    cache_h2 = (resident + cache_bytes) <= vmem_limit
    if use_h2_cache is not None:
        cache_h2 = bool(use_h2_cache)

    if cache_h2:
        # Phase 1 reads h2 from VMEM; pin x's block index so Pallas skips the re-DMA.
        x_index_map = lambda p, t: ((1 - p) * t + p * (num_tiles - 1), 0)
        h2_scratch = pltpu.VMEM((num_tiles, TB, H), jnp.float32)
    else:
        # Fallback for batches whose h2 cache does not fit VMEM: re-stream x, recompute.
        x_index_map = lambda p, t: (t, 0)
        h2_scratch = pltpu.VMEM((1, 8, 128), jnp.float32)      # unused placeholder

    const = lambda shape: pl.BlockSpec(shape, lambda p, t: (0, 0))
    kernel = functools.partial(_discriminator_kernel, batch=B, tile_rows=TB,
                               cache_h2=cache_h2)

    out = pl.pallas_call(
        kernel,
        out_shape=jax.ShapeDtypeStruct((num_tiles, 1, TB), jnp.float32),
        grid=(2, num_tiles),
        in_specs=[
            pl.BlockSpec((TB, L), x_index_map),   # activations: streamed / pipelined
            const((L, H)),                        # w1  (VMEM-resident)
            const((1, H)),                        # b1
            const((H, H)),                        # w2
            const((1, H)),                        # gamma
            const((1, H)),                        # beta
            const((8, H)),                        # w3 replicated rows
            const((1, 1)),                        # b3
        ],
        # Phase 0 never writes the output; pinning its block index to 0 ensures nothing
        # is flushed to HBM before grid step (1, 0) overwrites block 0.
        out_specs=pl.BlockSpec((1, 1, TB), lambda p, t: (p * t, 0, 0)),
        scratch_shapes=[pltpu.VMEM((1, H), jnp.float32),    # per-feature sum
                        pltpu.VMEM((1, H), jnp.float32),    # per-feature sum of squares
                        h2_scratch],                        # cached h2 tiles
        compiler_params=pltpu.CompilerParams(
            # Both axes must stay sequential on one core: the tile axis carries the
            # BN-stat accumulation and every phase-1 step depends on all of phase 0.
            dimension_semantics=("arbitrary", "arbitrary"),
            vmem_limit_bytes=vmem_limit,
        ),
    )(x, w1c, b1v, w2c, gammav, betav, w3rows, b3v)

    return out.reshape(B_pad, 1)[:B]


def discriminator_reference(x, params, compute_dtype=jnp.float32):
    """Pure-JAX reference for PyTorch training-mode forward (includes b2).

    `compute_dtype` mirrors the kernel's matmul input precision so the comparison is
    apples-to-apples; BN math stays in f32 either way."""
    w1, b1, w2, b2, w3, b3, gamma, beta = params
    H = w1.shape[1]
    xd = x.astype(compute_dtype)
    h1 = jnp.dot(xd, jnp.asarray(w1).astype(compute_dtype),
                 preferred_element_type=jnp.float32) + jnp.asarray(b1).reshape(1, H)
    h1 = jnp.maximum(h1, 0.0)
    h2 = jnp.dot(h1.astype(compute_dtype), jnp.asarray(w2).astype(compute_dtype),
                 preferred_element_type=jnp.float32) + jnp.asarray(b2).reshape(1, H)
    mean = jnp.mean(h2, axis=0, keepdims=True)
    var = jnp.mean((h2 - mean) ** 2, axis=0, keepdims=True)
    bn = (h2 - mean) * jax.lax.rsqrt(var + BN_EPS) * jnp.asarray(gamma).reshape(1, H) \
        + jnp.asarray(beta).reshape(1, H)
    bn = jnp.maximum(bn, 0.0)
    return bn @ jnp.asarray(w3).reshape(H, 1) + jnp.asarray(b3).reshape(1, 1)


def init_params(key, latent_space):
    # PyTorch nn.Linear default init: U(-1/sqrt(fan_in), 1/sqrt(fan_in)) for W and b.
    def linear(key, fan_in, fan_out):
        kw, kb = jax.random.split(key)
        bound = 1.0 / (fan_in ** 0.5)
        w = jax.random.uniform(kw, (fan_in, fan_out), jnp.float32, -bound, bound)
        b = jax.random.uniform(kb, (1, fan_out), jnp.float32, -bound, bound)
        return w, b

    k1, k2, k3 = jax.random.split(key, 3)
    w1, b1 = linear(k1, latent_space, HIDDEN)
    w2, b2 = linear(k2, HIDDEN, HIDDEN)
    w3, b3 = linear(k3, HIDDEN, 1)
    gamma = jnp.ones((1, HIDDEN), jnp.float32)   # BatchNorm1d weight
    beta = jnp.zeros((1, HIDDEN), jnp.float32)   # BatchNorm1d bias
    return (w1, b1, w2, b2, w3, b3, gamma, beta)


if __name__ == "__main__":
    key = jax.random.PRNGKey(0)
    kx, kp, kx2 = jax.random.split(key, 3)

    latent_space = 32
    params = init_params(kp, latent_space)

    # 1) Small batch, full-f32 path (single tile): tight check vs the f32 reference.
    x = jax.random.normal(kx, (8, latent_space), jnp.float32)
    out = discriminator_forward(x, params, compute_dtype=jnp.float32)
    jax.block_until_ready(out)
    assert out.shape == (8, 1)
    ref = discriminator_reference(x, params)
    err = float(jnp.max(jnp.abs(out - ref)))
    assert jnp.allclose(out, ref, atol=4e-3, rtol=4e-3), f"f32 small-batch mismatch {err}"

    # 2) Multi-tile bf16 path (VMEM h2 cache, pinned phase-1 x DMA, lane-dense output).
    x2 = jax.random.normal(kx2, (300, latent_space), jnp.float32)
    out2 = discriminator_forward(x2, params, tile_rows=128, compute_dtype=jnp.bfloat16)
    jax.block_until_ready(out2)
    assert out2.shape == (300, 1)
    ref2 = discriminator_reference(x2, params, compute_dtype=jnp.bfloat16)
    err2 = float(jnp.max(jnp.abs(out2 - ref2)))
    assert jnp.allclose(out2, ref2, atol=8e-3, rtol=8e-3), f"bf16 tiled mismatch {err2}"

    # 3) Recompute fallback path (h2 cache disabled, x re-streamed), f32, multi-tile.
    out3 = discriminator_forward(x2, params, tile_rows=128,
                                 compute_dtype=jnp.float32, use_h2_cache=False)
    jax.block_until_ready(out3)
    ref3 = discriminator_reference(x2, params)
    err3 = float(jnp.max(jnp.abs(out3 - ref3)))
    assert jnp.allclose(out3, ref3, atol=4e-3, rtol=4e-3), f"fallback mismatch {err3}"

    print("KERNEL_OK")
</pallas_src>

<mosaic_0001>
module attributes {stable_mosaic.version = 11 : i64} {
  func.func @_discriminator_kernel(%arg0: i32, %arg1: i32, %arg2: memref<8x32xf32, #tpu.memory_space<vmem>>, %arg3: memref<32x64xf32, #tpu.memory_space<vmem>>, %arg4: memref<1x64xf32, #tpu.memory_space<vmem>>, %arg5: memref<64x64xf32, #tpu.memory_space<vmem>>, %arg6: memref<1x64xf32, #tpu.memory_space<vmem>>, %arg7: memref<1x64xf32, #tpu.memory_space<vmem>>, %arg8: memref<8x64xf32, #tpu.memory_space<vmem>>, %arg9: memref<1x1xf32, #tpu.memory_space<vmem>>, %arg10: memref<1x1x8xf32, #tpu.memory_space<vmem>>, %arg11: memref<1x64xf32, #tpu.memory_space<vmem>>, %arg12: memref<1x64xf32, #tpu.memory_space<vmem>>, %arg13: memref<1x8x64xf32, #tpu.memory_space<vmem>>) attributes {dimension_semantics = [#tpu.dimension_semantics<arbitrary>, #tpu.dimension_semantics<arbitrary>], iteration_bounds = array<i64: 2, 1>, scalar_prefetch = 0 : i64, scratch_operands = 3 : i64, tpu.core_type = #tpu.core_type<tc>, window_params = [{transform_indices = @transform_0, window_bounds = array<i64: 8, 32>}, {pipeline_mode = #tpu.pipeline_mode<synchronous>, transform_indices = @transform_1, window_bounds = array<i64: 32, 64>}, {pipeline_mode = #tpu.pipeline_mode<synchronous>, transform_indices = @transform_2, window_bounds = array<i64: 1, 64>}, {pipeline_mode = #tpu.pipeline_mode<synchronous>, transform_indices = @transform_3, window_bounds = array<i64: 64, 64>}, {pipeline_mode = #tpu.pipeline_mode<synchronous>, transform_indices = @transform_4, window_bounds = array<i64: 1, 64>}, {pipeline_mode = #tpu.pipeline_mode<synchronous>, transform_indices = @transform_5, window_bounds = array<i64: 1, 64>}, {pipeline_mode = #tpu.pipeline_mode<synchronous>, transform_indices = @transform_6, window_bounds = array<i64: 8, 64>}, {pipeline_mode = #tpu.pipeline_mode<synchronous>, transform_indices = @transform_7, window_bounds = array<i64: 1, 1>}, {transform_indices = @transform_8, window_bounds = array<i64: 1, 1, 8>}]} {
    %c0_i32 = arith.constant 0 : i32
    %0 = arith.cmpi eq, %arg0, %c0_i32 : i32
    %1 = arith.extui %0 : i1 to i32
    %c0_i32_0 = arith.constant 0 : i32
    %2 = arith.cmpi ne, %1, %c0_i32_0 : i32
    scf.if %2 {
      %c0_i32_2 = arith.constant 0 : i32
      %6 = arith.cmpi eq, %arg1, %c0_i32_2 : i32
      %7 = arith.extui %6 : i1 to i32
      %c0_i32_3 = arith.constant 0 : i32
      %8 = arith.cmpi ne, %7, %c0_i32_3 : i32
      scf.if %8 {
        %cst_27 = arith.constant 0.000000e+00 : f32
        %44 = vector.broadcast %cst_27 : f32 to vector<1x64xf32>
        %c0_28 = arith.constant 0 : index
        %c0_29 = arith.constant 0 : index
        %45 = vector.load %arg11[%c0_28, %c0_29] : memref<1x64xf32, #tpu.memory_space<vmem>>, vector<1x64xf32>
        tpu.vector_store %arg11[%c0_28, %c0_29], %44 {strides = array<i32>} : memref<1x64xf32, #tpu.memory_space<vmem>>, vector<1x64xf32>,
        %cst_30 = arith.constant 0.000000e+00 : f32
        %46 = vector.broadcast %cst_30 : f32 to vector<1x64xf32>
        %c0_31 = arith.constant 0 : index
        %c0_32 = arith.constant 0 : index
        %47 = vector.load %arg12[%c0_31, %c0_32] : memref<1x64xf32, #tpu.memory_space<vmem>>, vector<1x64xf32>
        tpu.vector_store %arg12[%c0_31, %c0_32], %46 {strides = array<i32>} : memref<1x64xf32, #tpu.memory_space<vmem>>, vector<1x64xf32>,
      } else {
      }
      %c0 = arith.constant 0 : index
      %c0_4 = arith.constant 0 : index
      %9 = vector.load %arg2[%c0, %c0_4] : memref<8x32xf32, #tpu.memory_space<vmem>>, vector<8x32xf32>
      %c0_5 = arith.constant 0 : index
      %c0_6 = arith.constant 0 : index
      %10 = vector.load %arg3[%c0_5, %c0_6] : memref<32x64xf32, #tpu.memory_space<vmem>>, vector<32x64xf32>
      %cst = arith.constant dense<0.000000e+00> : vector<8x64xf32>
      %11 = tpu.matmul %9, %10, %cst {dimension_numbers = #tpu.dot_dimension_numbers<[1], [0], [0], [1], [0, 0, 1, 1], [], []>} : vector<8x32xf32>, vector<32x64xf32>, vector<8x64xf32> -> vector<8x64xf32>
      %c0_7 = arith.constant 0 : index
      %c0_8 = arith.constant 0 : index
      %12 = vector.load %arg4[%c0_7, %c0_8] : memref<1x64xf32, #tpu.memory_space<vmem>>, vector<1x64xf32>
      %13 = vector.broadcast %12 : vector<1x64xf32> to vector<8x64xf32>
      %14 = arith.addf %11, %13 : vector<8x64xf32>
      %cst_9 = arith.constant 0.000000e+00 : f32
      %15 = vector.broadcast %cst_9 : f32 to vector<8x64xf32>
      %16 = arith.maximumf %14, %15 : vector<8x64xf32>
      %c0_10 = arith.constant 0 : index
      %c0_11 = arith.constant 0 : index
      %17 = vector.load %arg5[%c0_10, %c0_11] : memref<64x64xf32, #tpu.memory_space<vmem>>, vector<64x64xf32>
      %cst_12 = arith.constant dense<0.000000e+00> : vector<8x64xf32>
      %18 = tpu.matmul %16, %17, %cst_12 {dimension_numbers = #tpu.dot_dimension_numbers<[1], [0], [0], [1], [0, 0, 1, 1], [], []>} : vector<8x64xf32>, vector<64x64xf32>, vector<8x64xf32> -> vector<8x64xf32>
      %19 = arith.index_cast %arg1 : i32 to index
      %c0_13 = arith.constant 0 : index
      %c0_14 = arith.constant 0 : index
      %20 = vector.load %arg13[%19, %c0_13, %c0_14] : memref<1x8x64xf32, #tpu.memory_space<vmem>>, vector<1x8x64xf32>
      %21 = vector.shape_cast %20 : vector<1x8x64xf32> to vector<8x64xf32>
      %22 = vector.shape_cast %18 : vector<8x64xf32> to vector<1x8x64xf32>
      tpu.vector_store %arg13[%19, %c0_13, %c0_14], %22 {strides = array<i32>} : memref<1x8x64xf32, #tpu.memory_space<vmem>>, vector<1x8x64xf32>,
      %c8_i32 = arith.constant 8 : i32
      %23 = arith.muli %arg1, %c8_i32 : i32
      %24 = tpu.iota {dimensions = array<i32: 0>} : vector<8x1xi32>
      %25 = vector.broadcast %23 : i32 to vector<8x1xi32>
      %26 = arith.addi %25, %24 : vector<8x1xi32>
      %c8_i32_15 = arith.constant 8 : i32
      %27 = vector.broadcast %c8_i32_15 : i32 to vector<8x1xi32>
      %28 = arith.cmpi slt, %26, %27 : vector<8x1xi32>
      %cst_16 = arith.constant 0.000000e+00 : f32
      %29 = vector.shape_cast %28 : vector<8x1xi1> to vector<8x1xi1>
      %30 = vector.broadcast %29 : vector<8x1xi1> to vector<8x64xi1>
      %31 = vector.broadcast %cst_16 : f32 to vector<8x64xf32>
      %32 = arith.select %30, %18, %31 : vector<8x64xi1>, vector<8x64xf32>
      %c0_17 = arith.constant 0 : index
      %c0_18 = arith.constant 0 : index
      %33 = vector.load %arg11[%c0_17, %c0_18] : memref<1x64xf32, #tpu.memory_space<vmem>>, vector<1x64xf32>
      %cst_19 = arith.constant dense<0.000000e+00> : vector<64xf32>
      %34 = vector.multi_reduction <add>, %32, %cst_19 [0] : vector<8x64xf32> to vector<64xf32>
      %35 = vector.shape_cast %34 : vector<64xf32> to vector<1x64xf32>
      %36 = arith.addf %33, %35 : vector<1x64xf32>
      %c0_20 = arith.constant 0 : index
      %c0_21 = arith.constant 0 : index
      %37 = vector.load %arg11[%c0_20, %c0_21] : memref<1x64xf32, #tpu.memory_space<vmem>>, vector<1x64xf32>
      tpu.vector_store %arg11[%c0_20, %c0_21], %36 {strides = array<i32>} : memref<1x64xf32, #tpu.memory_space<vmem>>, vector<1x64xf32>,
      %c0_22 = arith.constant 0 : index
      %c0_23 = arith.constant 0 : index
      %38 = vector.load %arg12[%c0_22, %c0_23] : memref<1x64xf32, #tpu.memory_space<vmem>>, vector<1x64xf32>
      %39 = arith.mulf %32, %32 : vector<8x64xf32>
      %cst_24 = arith.constant dense<0.000000e+00> : vector<64xf32>
      %40 = vector.multi_reduction <add>, %39, %cst_24 [0] : vector<8x64xf32> to vector<64xf32>
      %41 = vector.shape_cast %40 : vector<64xf32> to vector<1x64xf32>
      %42 = arith.addf %38, %41 : vector<1x64xf32>
      %c0_25 = arith.constant 0 : index
      %c0_26 = arith.constant 0 : index
      %43 = vector.load %arg12[%c0_25, %c0_26] : memref<1x64xf32, #tpu.memory_space<vmem>>, vector<1x64xf32>
      tpu.vector_store %arg12[%c0_25, %c0_26], %42 {strides = array<i32>} : memref<1x64xf32, #tpu.memory_space<vmem>>, vector<1x64xf32>,
    } else {
    }
    %c1_i32 = arith.constant 1 : i32
    %3 = arith.cmpi eq, %arg0, %c1_i32 : i32
    %4 = arith.extui %3 : i1 to i32
    %c0_i32_1 = arith.constant 0 : i32
    %5 = arith.cmpi ne, %4, %c0_i32_1 : i32
    scf.if %5 {
      %6 = arith.index_cast %arg1 : i32 to index
      %c0 = arith.constant 0 : index
      %c0_2 = arith.constant 0 : index
      %7 = vector.load %arg13[%6, %c0, %c0_2] : memref<1x8x64xf32, #tpu.memory_space<vmem>>, vector<1x8x64xf32>
      %8 = vector.shape_cast %7 : vector<1x8x64xf32> to vector<8x64xf32>
      %c0_3 = arith.constant 0 : index
      %c0_4 = arith.constant 0 : index
      %9 = vector.load %arg11[%c0_3, %c0_4] : memref<1x64xf32, #tpu.memory_space<vmem>>, vector<1x64xf32>
      %cst = arith.constant 1.250000e-01 : f32
      %10 = vector.broadcast %cst : f32 to vector<1x64xf32>
      %11 = arith.mulf %9, %10 : vector<1x64xf32>
      %c0_5 = arith.constant 0 : index
      %c0_6 = arith.constant 0 : index
      %12 = vector.load %arg12[%c0_5, %c0_6] : memref<1x64xf32, #tpu.memory_space<vmem>>, vector<1x64xf32>
      %cst_7 = arith.constant 1.250000e-01 : f32
      %13 = vector.broadcast %cst_7 : f32 to vector<1x64xf32>
      %14 = arith.mulf %12, %13 : vector<1x64xf32>
      %15 = arith.mulf %11, %11 : vector<1x64xf32>
      %16 = arith.subf %14, %15 : vector<1x64xf32>
      %cst_8 = arith.constant 0.000000e+00 : f32
      %17 = vector.broadcast %cst_8 : f32 to vector<1x64xf32>
      %18 = arith.maximumf %16, %17 : vector<1x64xf32>
      %cst_9 = arith.constant 9.99999974E-6 : f32
      %19 = vector.broadcast %cst_9 : f32 to vector<1x64xf32>
      %20 = arith.addf %18, %19 : vector<1x64xf32>
      %21 = math.rsqrt %20 : vector<1x64xf32>
      %c0_10 = arith.constant 0 : index
      %c0_11 = arith.constant 0 : index
      %22 = vector.load %arg6[%c0_10, %c0_11] : memref<1x64xf32, #tpu.memory_space<vmem>>, vector<1x64xf32>
      %23 = arith.mulf %21, %22 : vector<1x64xf32>
      %c0_12 = arith.constant 0 : index
      %c0_13 = arith.constant 0 : index
      %24 = vector.load %arg7[%c0_12, %c0_13] : memref<1x64xf32, #tpu.memory_space<vmem>>, vector<1x64xf32>
      %25 = arith.mulf %11, %23 : vector<1x64xf32>
      %26 = arith.subf %24, %25 : vector<1x64xf32>
      %27 = vector.broadcast %23 : vector<1x64xf32> to vector<8x64xf32>
      %28 = arith.mulf %8, %27 : vector<8x64xf32>
      %29 = vector.broadcast %26 : vector<1x64xf32> to vector<8x64xf32>
      %30 = arith.addf %28, %29 : vector<8x64xf32>
      %cst_14 = arith.constant 0.000000e+00 : f32
      %31 = vector.broadcast %cst_14 : f32 to vector<8x64xf32>
      %32 = arith.maximumf %30, %31 : vector<8x64xf32>
      %c0_15 = arith.constant 0 : index
      %c0_16 = arith.constant 0 : index
      %33 = vector.load %arg8[%c0_15, %c0_16] : memref<8x64xf32, #tpu.memory_space<vmem>>, vector<8x64xf32>
      %cst_17 = arith.constant dense<0.000000e+00> : vector<8x8xf32>
      %34 = tpu.matmul %33, %32, %cst_17 {dimension_numbers = #tpu.dot_dimension_numbers<[1], [1], [0], [0], [0, 0, 1, 0], [], []>, precision = #tpu.contract_precision<fp32>} : vector<8x64xf32>, vector<8x64xf32>, vector<8x8xf32> -> vector<8x8xf32>
      %35 = vector.extract_strided_slice %34 {offsets = [0, 0], sizes = [1, 8], strides = [1, 1]} : vector<8x8xf32> to vector<1x8xf32>
      %c0_18 = arith.constant 0 : index
      %c0_19 = arith.constant 0 : index
      %36 = vector.load %arg9[%c0_18, %c0_19] : memref<1x1xf32, #tpu.memory_space<vmem>>, vector<1x1xf32>
      %37 = vector.broadcast %36 : vector<1x1xf32> to vector<1x8xf32>
      %38 = arith.addf %35, %37 : vector<1x8xf32>
      %c0_20 = arith.constant 0 : index
      %c0_21 = arith.constant 0 : index
      %c0_22 = arith.constant 0 : index
      %39 = vector.load %arg10[%c0_20, %c0_21, %c0_22] : memref<1x1x8xf32, #tpu.memory_space<vmem>>, vector<1x1x8xf32>
      %40 = vector.shape_cast %39 : vector<1x1x8xf32> to vector<1x8xf32>
      %41 = vector.shape_cast %38 : vector<1x8xf32> to vector<1x1x8xf32>
      tpu.vector_store %arg10[%c0_20, %c0_21, %c0_22], %41 {strides = array<i32>} : memref<1x1x8xf32, #tpu.memory_space<vmem>>, vector<1x1x8xf32>,
    } else {
    }
    return
  }
  func.func @transform_0(%arg0: i32, %arg1: i32) -> (i32, i32) {
    %c1_i32 = arith.constant 1 : i32
    %0 = arith.subi %c1_i32, %arg0 : i32
    %1 = arith.muli %0, %arg1 : i32
    %c0_i32 = arith.constant 0 : i32
    %2 = arith.muli %arg0, %c0_i32 : i32
    %3 = arith.addi %1, %2 : i32
    %c0_i32_0 = arith.constant 0 : i32
    %c0_i32_1 = arith.constant 0 : i32
    return %3, %c0_i32_0 : i32, i32
  }
  func.func @transform_1(%arg0: i32, %arg1: i32) -> (i32, i32) {
    %c0_i32 = arith.constant 0 : i32
    %c0_i32_0 = arith.constant 0 : i32
    %c0_i32_1 = arith.constant 0 : i32
    return %c0_i32, %c0_i32_0 : i32, i32
  }
  func.func @transform_2(%arg0: i32, %arg1: i32) -> (i32, i32) {
    %c0_i32 = arith.constant 0 : i32
    %c0_i32_0 = arith.constant 0 : i32
    %c0_i32_1 = arith.constant 0 : i32
    return %c0_i32, %c0_i32_0 : i32, i32
  }
  func.func @transform_3(%arg0: i32, %arg1: i32) -> (i32, i32) {
    %c0_i32 = arith.constant 0 : i32
    %c0_i32_0 = arith.constant 0 : i32
    %c0_i32_1 = arith.constant 0 : i32
    return %c0_i32, %c0_i32_0 : i32, i32
  }
  func.func @transform_4(%arg0: i32, %arg1: i32) -> (i32, i32) {
    %c0_i32 = arith.constant 0 : i32
    %c0_i32_0 = arith.constant 0 : i32
    %c0_i32_1 = arith.constant 0 : i32
    return %c0_i32, %c0_i32_0 : i32, i32
  }
  func.func @transform_5(%arg0: i32, %arg1: i32) -> (i32, i32) {
    %c0_i32 = arith.constant 0 : i32
    %c0_i32_0 = arith.constant 0 : i32
    %c0_i32_1 = arith.constant 0 : i32
    return %c0_i32, %c0_i32_0 : i32, i32
  }
  func.func @transform_6(%arg0: i32, %arg1: i32) -> (i32, i32) {
    %c0_i32 = arith.constant 0 : i32
    %c0_i32_0 = arith.constant 0 : i32
    %c0_i32_1 = arith.constant 0 : i32
    return %c0_i32, %c0_i32_0 : i32, i32
  }
  func.func @transform_7(%arg0: i32, %arg1: i32) -> (i32, i32) {
    %c0_i32 = arith.constant 0 : i32
    %c0_i32_0 = arith.constant 0 : i32
    %c0_i32_1 = arith.constant 0 : i32
    return %c0_i32, %c0_i32_0 : i32, i32
  }
  func.func @transform_8(%arg0: i32, %arg1: i32) -> (i32, i32, i32) {
    %0 = arith.muli %arg0, %arg1 : i32
    %c0_i32 = arith.constant 0 : i32
    %c0_i32_0 = arith.constant 0 : i32
    %c0_i32_1 = arith.constant 0 : i32
    return %0, %c0_i32, %c0_i32_0 : i32, i32, i32
  }
}

</mosaic_0001>

<bundles_post_ra>
// kernel: tpu_custom_call.1
= control target key start
LH: loop header
LB: loop body
LE: loop exit
PB: predicated region body
PF: predicated region fallthrough
CT: control target
= control target key end

     0   :  { %s1810_s0 = inlined_call_operand.hbm [shape: f32[8,32], index: 0, kind: input, shape index: {}]   ;;  %s1811_s1 = inlined_call_operand.hbm [shape: f32[32,64], index: 1, kind: input, shape index: {}]   ;;  %s1812_s2 = inlined_call_operand.vmem [shape: f32[1,64], index: 2, kind: input, shape index: {}]   ;;  %s1813_s3 = inlined_call_operand.hbm [shape: f32[64,64], index: 3, kind: input, shape index: {}]   ;;  %s1814_s4 = inlined_call_operand.vmem [shape: f32[1,64], index: 4, kind: input, shape index: {}]   ;;  %s1815_s5 = inlined_call_operand.vmem [shape: f32[1,64], index: 5, kind: input, shape index: {}]   ;;  %s1816_s6 = inlined_call_operand.vmem [shape: f32[8,64], index: 6, kind: input, shape index: {}]   ;;  %s1817_s7 = inlined_call_operand.<no memory space> [shape: f32[1,1], index: 7, kind: input, shape index: {}]   ;;  %s1818_s8 = inlined_call_operand.hbm [shape: f32[1,1,8], index: 8, kind: output, shape index: {}]  }
   0x1   :  { %v13_v0 = vstv %s1817_s7 }
   0x2   :  { %14 = vst [vmem:[#allocation5] sm:$0x1] %v13_v0 }
   0x3   :  { %15 = vsyncpa [#allocation7], 0 }
   0x4   :  { %17 = vsyncpa [#allocation7 + $0x1], 0 }
   0x5   :  { %18 = vsyncpa [#allocation10], 0 }
   0x6   :  { %19 = vsyncpa [#allocation8], 0 }
   0x7   :  { %21 = vsyncpa [#allocation8 + $0x1], 0  ;;  %s1611_s29 = smov 0   ;;  %s1613_s30 = smov 0  }
   0x8   :  { %s1615_s9 = smov 0  }
   0x9 LB: > { %s1201_s7 = sadd.s32 4294967295, %s1549_s9   ;;  %s1202_s10 = sadd.s32 4294967294, %s1549_s9   ;;  %s1549_s9 = sphi %s1615_s9, %s27_s9   ;;  %s1545_s30 = sphi %s1613_s30, %s1833_s30   ;;  %s1541_s29 = sphi %s1611_s29, %s1832_s29  }
   0xa   : > { %s39_s11 = sadd.s32 1, %s1545_s30  ;;  %p1203_p0 = scmp.ge.s32.totalorder %s1549_s9, 1 }
   0xb   : > { %p41_p1 = scmp.ge.s32.totalorder %s39_s11, 2  ;;  %p249_p2 = scmp.lt.s32.totalorder %s1549_s9, 3 }
   0xc   : > { %p1633_p3 = scmp.eq.s32.totalorder %s1201_s7, 0  ;;  %s1551_s14 = smov [#allocation9]  }
   0xd   : > { %s1835_s11 = smov (%p41_p1, %s39_s11), 0  ;;  %p1639_p4 = pnand %p1203_p0, %p249_p2 }
   0xe   : > { %s1822_s12 = scalar_select %p1633_p3, 1, 0 }
   0xf   : > { %s1823_s13 = scalar_select %p1639_p4, 1, 0 }
  0x10   : > { %s261_s15 = sshll.u32 %s1551_s14, 4  ;;  %p1341_p5 = pneg %p1639_p4  ;;  %s262_s15 = int_to_ptr.vmem [resolvable:$true] %s261_s15 }
  0x11   : > { %s1552_s17 = smov [#allocation11]   ;;  %s1405_s21 = scalar_lea.hbm %s1811_s1, 512 }
  0x12   : > { %p1648_p7 = pnand %p1633_p3, %p1341_p5  ;;  %s277_s18 = sshll.u32 %s1552_s17, 4  ;;  %s278_s18 = int_to_ptr.vmem [resolvable:$true] %s277_s18 }
  0x13   : > { %p1406_p9 = scmp.ne.s32.totalorder %s1811_s1, %s1405_s21  ;;  %p1412_p13 = scmp.lt.u32.totalorder %s1405_s21, %s1811_s1 }
  0x14   : > { %p1407_p10 = pneg %p1648_p7 }
  0x16   : > { %p1408_p11 = pnand %p1407_p10, %p1406_p9 }
  0x18   : > { %p1409_p12 = pneg %p1408_p11 }
  0x1a   : > { %p1414_p0 = pnand %p1412_p13, %p1409_p12 }
  0x1c   : > { %1417 = shalt.err (!%p1414_p0)
}
  0x1d   : > { %s1418_s26 = scalar_lea.vmem %s262_s15, 512  ;;  %p1426_p6 = scmp.lt.s32.totalorder %s262_s15, %s262_s15 }
  0x1e   : > { %p1419_p1 = scmp.ne.s32.totalorder %s262_s15, %s1418_s26  ;;  %p1427_p8 = scmp.lt.s32.totalorder %s1418_s26, %s1418_s26 }
  0x20   : > { %p1421_p2 = pnand %p1419_p1, %p1407_p10  ;;  %p1428_p3 = por %p1427_p8, %p1426_p6 }
  0x22   : > { %p1422_p5 = pneg %p1421_p2 }
  0x24   : > { %p1429_p4 = pnand %p1428_p3, %p1422_p5 }
  0x26   : > { %1432 = shalt.err (!%p1429_p4)
}
  0x27   : > { %s1553_s27 = smov 128   ;;  %s1554_s28 = smov 8  }
  0x28   : > { %1344 = dma.hbm_to_vmem [thread:$0]  (!%p1648_p7), %s1811_s1, 512, %s262_s15, [#allocation10], %s1553_s27, %s1553_s27, %s1554_s28  }
  0x29   : > { %s1433_s21 = scalar_lea.hbm %s1813_s3, 1024 }
  0x2a   : > { %p1434_p3 = scmp.ne.s32.totalorder %s1813_s3, %s1433_s21  ;;  %p1440_p8 = scmp.lt.u32.totalorder %s1433_s21, %s1813_s3 }
  0x2c   : > { %p1436_p4 = pnand %p1434_p3, %p1407_p10 }
  0x2e   : > { %p1437_p6 = pneg %p1436_p4 }
  0x30   : > { %p1442_p11 = pnand %p1440_p8, %p1437_p6 }
  0x32   : > { %1445 = shalt.err (!%p1442_p11)
}
  0x33   : > { %s1446_s15 = scalar_lea.vmem %s278_s18, 1024  ;;  %p1454_p1 = scmp.lt.s32.totalorder %s278_s18, %s278_s18 }
  0x34   : > { %p1447_p12 = scmp.ne.s32.totalorder %s278_s18, %s1446_s15  ;;  %p1455_p2 = scmp.lt.s32.totalorder %s1446_s15, %s1446_s15 }
  0x36   : > { %p1449_p13 = pnand %p1447_p12, %p1407_p10  ;;  %p1456_p5 = por %p1455_p2, %p1454_p1 }
  0x38   : > { %p1450_p0 = pneg %p1449_p13 }
  0x3a   : > { %p1457_p9 = pnand %p1456_p5, %p1450_p0 }
  0x3c   : > { %1460 = shalt.err (!%p1457_p9)
}
  0x3d   : > { %1347 = dma.hbm_to_vmem [thread:$0]  (!%p1648_p7), %s1813_s3, 1024, %s278_s18, [#allocation10], %s1553_s27, %s1553_s27, %s1554_s28  }
  0x3e   : > { %p1825_p3 = scmp.lt.s32.totalorder %s1549_s9, 2  ;;  %p1826_p4 = scmp.eq.s32.totalorder %s1549_s9, 0 }
  0x3f   : > { %s1555_s19 = smov [#allocation6]   ;;  %s1461_s16 = scalar_lea.hbm %s1810_s0, 128 }
  0x40   : > { %p1700_p6 = pnand %p1826_p4, %p1825_p3  ;;  %s316_s20 = sshll.u32 %s1555_s19, 4  ;;  %s317_s20 = int_to_ptr.vmem [resolvable:$true] %s316_s20 }
  0x41   : > { %p1462_p10 = scmp.ne.s32.totalorder %s1810_s0, %s1461_s16  ;;  %p1468_p11 = scmp.lt.u32.totalorder %s1461_s16, %s1810_s0 }
  0x42   : > { %p1463_p7 = pneg %p1700_p6 }
  0x44   : > { %p1464_p9 = pnand %p1463_p7, %p1462_p10 }
  0x46   : > { %p1465_p8 = pneg %p1464_p9 }
  0x48   : > { %p1470_p12 = pnand %p1468_p11, %p1465_p8 }
  0x4a   : > { %1473 = shalt.err (!%p1470_p12)
}
  0x4b   : > { %s1474_s28 = scalar_lea.vmem %s317_s20, 128  ;;  %s1481_s25 = scalar_lea.vmem %s317_s20, 256 }
  0x4c   : > { %p1475_p13 = scmp.ne.s32.totalorder %s317_s20, %s1474_s28  ;;  %p1482_p2 = scmp.lt.s32.totalorder %s317_s20, %s317_s20 }
  0x4d   : > { %p1483_p5 = scmp.lt.s32.totalorder %s1481_s25, %s1474_s28 }
  0x4e   : > { %p1477_p0 = pnand %p1475_p13, %p1463_p7 }
  0x4f   : > { %p1484_p3 = por %p1483_p5, %p1482_p2 }
  0x50   : > { %p1478_p1 = pneg %p1477_p0 }
  0x52   : > { %p1485_p4 = pnand %p1484_p3, %p1478_p1 }
  0x54   : > { %1488 = shalt.err (!%p1485_p4)
}
  0x55   : > { %1351 = dma.hbm_to_vmem [thread:$0]  (!%p1700_p6), %s1810_s0, 128, %s317_s20, [#allocation7]  }
  0x56   : > { %p1828_p10 = scmp.ne.s32.totalorder %s1823_s13, 0 }
  0x57   : > { %p1829_p9 = scmp.ne.s32.totalorder (!%p1828_p10), %s1822_s12, 0 }
  0x58   : > { %325 = sbr.rel (%p1828_p10) target bundleno = 856 (0x358), region = 52 }
  0x5f   : > { %1528 = dma.done.wait (%p1829_p9), [#allocation7], 128  }
  0x60   : > { %1530 = vsyncadd (%p1829_p9), [#allocation7], 4294967168 }
  0x61   : > { %1532 = dma.done.wait (%p1829_p9), [#allocation10], 1536  }
  0x62   : > { %1534 = vsyncadd (%p1829_p9), [#allocation10], 4294965760  ;;  %p1212_p7 = scmp.ne.s32.totalorder %s1541_s29, 0 }
  0x63   : > { %v386_v1 = vld [vmem:[#allocation9] sm:$0xff] (!%p1212_p7)  ;;  %v387_v2 = vld [vmem:[#allocation9 + $0x8] sm:$0xff] (!%p1212_p7)  ;;  %v388_v3 = vld [vmem:[#allocation9 + $0x10] sm:$0xff] (!%p1212_p7)  ;;  %vm382_vm0 = vcmask (!%p1212_p7), 516096   ;;  %v1556_v4 = vmov (!%p1212_p7), 0.0|0.0   ;;  %v1557_v7 = vmov (!%p1212_p7), 0.0  }
  0x64   : > { %377 = sbr.rel (%p1212_p7) target bundleno = 556 (0x22c), region = 68  ;;  %1307 = vmatprep.subr.bf16.mxu0 (!%p1212_p7), %v1556_v4  ;;  %v1308_v5 = vpack.c.bf16 (!%p1212_p7), %v387_v2, %v386_v1  ;;  %v389_v6 = vld [vmem:[#allocation9 + $0x18] sm:$0xff] (!%p1212_p7)  ;;  %383 = vst.msk [vmem:[#allocation2] sm:$0x1] (!%p1212_p7), %vm382_vm0, %v1557_v7  ;;  %384 = vst.msk [vmem:[#allocation3] sm:$0x1] (!%p1212_p7), %vm382_vm0, %v1557_v7  ;;  %1313 = vmatprep.subr.bf16.mxu1 (!%p1212_p7), %v1556_v4 }
  0x65   : > { %v472_v8 = vld [vmem:[#allocation11] sm:$0xff] (!%p1212_p7)  ;;  %vm1558_vm1 = vmmov (!%p1212_p7), 0   ;;  %v473_v9 = vld [vmem:[#allocation11 + $0x8] sm:$0xff] (!%p1212_p7)  ;;  %v474_v10 = vld [vmem:[#allocation11 + $0x10] sm:$0xff] (!%p1212_p7)  ;;  %v1311_v12 = vpack.c.bf16 (!%p1212_p7), %v389_v6, %v388_v3  ;;  %vm397_vm2 = vcmask (!%p1212_p7), 261120   ;;  %vm480_vm3 = vcmask (!%p1212_p7), 523264  }
  0x66   : > { %1255 = vmatprep.mubr.msk.f32.mxu0 (!%p1212_p7), %vm1558_vm1, %v1557_v7  ;;  %v475_v11 = vld [vmem:[#allocation11 + $0x18] sm:$0xff] (!%p1212_p7)  ;;  %1274 = vmatprep.mubr.msk.f32.mxu1 (!%p1212_p7), %vm1558_vm1, %v1557_v7  ;;  %v1314_v13 = vpack.c.bf16 (!%p1212_p7), %v473_v9, %v472_v8  ;;  %v476_v15 = vld [vmem:[#allocation11 + $0x20] sm:$0xff] (!%p1212_p7)  ;;  %v477_v16 = vld [vmem:[#allocation11 + $0x28] sm:$0xff] (!%p1212_p7) }
  0x67   : > { %1309 = vmatpush3.bf16.msra.mxu0 (!%p1212_p7), %v1308_v5  ;;  %v1317_v14 = vpack.c.bf16 (!%p1212_p7), %v475_v11, %v474_v10  ;;  %v385_v17 = vld [vmem:[#allocation6] sm:$0xff] (!%p1212_p7)  ;;  %v1320_v18 = vpack.c.bf16 (!%p1212_p7), %v477_v16, %v476_v15  ;;  %v479_v20 = vld [vmem:[#allocation11 + $0x38] sm:$0xff] (!%p1212_p7)  ;;  %v1213_v22 = vld [vmem:[%s1812_s2] ss:$0 sm:$0xff] (!%p1212_p7) }
  0x68   : > { %1310 = vmatprep.subr.bf16.mxu0 (!%p1212_p7), %v1556_v4  ;;  %1315 = vmatpush3.bf16.msra.mxu1 (!%p1212_p7), %v1314_v13  ;;  %v478_v19 = vld [vmem:[#allocation11 + $0x30] sm:$0xff] (!%p1212_p7) }
  0x69   : > { %1316 = vmatprep.subr.bf16.mxu1 (!%p1212_p7), %v1556_v4  ;;  %v1323_v21 = vpack.c.bf16 (!%p1212_p7), %v479_v20, %v478_v19 }
  0x6b   : > { %1312 = vmatpush3.bf16.msra.mxu0 %v1311_v12  ;;  %v565_v41 = vld [vmem:[#allocation2] sm:$0x1]  ;;  %v576_v44 = vld [vmem:[#allocation3] sm:$0x1] }
  0x6c   : > { %1318 = vmatpush3.bf16.msra.mxu1 %v1317_v14 }
  0x6d   : > { %1319 = vmatprep.subr.bf16.mxu1 %v1556_v4 }
  0x6e   : > { %1256 = vmatmul.mubr.msk.f32.vlgmr.msra.gmra.mrb[0].mxu0 %vm397_vm2, %v385_v17 }
  0x70   : > { %1321 = vmatpush3.bf16.msra.mxu1 %v1320_v18 }
  0x71   : > { %1322 = vmatprep.subr.bf16.mxu1 %v1556_v4 }
  0x74   : > { %1324 = vmatpush3.bf16.msra.mxu1 %v1323_v21 }
 0x141   : > { %v467_v23 = vpop.f32.mrb[0].mxu0 }
 0x142   : > { %v468_v24 = vadd.f32 %v1213_v22, %v467_v23  ;;  %v1257_v25 = vpop.f32.mrb[1].mxu0 }
 0x144   : > { %v471_v26 = vmax.f32 %v468_v24, 0.0 }
 0x146   : > { %1275 = vmatmul.mubr.msk.f32.vlgmr.msra.gmra.mrb[0].mxu1 %vm480_vm3, %v471_v26 }
 0x219   : > { %v550_v27 = vpop.f32.mrb[0].mxu1 }
 0x21a   : > { %556 = vst.msk [vmem:[#allocation4] sm:$0xff] %vm480_vm3, %v550_v27  ;;  %v566_v28 = vsel %vm480_vm3, %v550_v27, 0.0  ;;  %v577_v29 = vmul.f32 %v550_v27, %v550_v27  ;;  %v1276_v30 = vpop.f32.mrb[1].mxu1 }
 0x21b   : > { %v567_v31 = vrot.slane %v566_v28, 4 }
 0x21c   : > { %v578_v32 = vsel %vm480_vm3, %v577_v29, 0.0 }
 0x21d   : > { %v568_v33 = vadd.f32 %v567_v31, %v566_v28  ;;  %v579_v34 = vrot.slane %v578_v32, 4 }
 0x21f   : > { %v569_v35 = vrot.slane %v568_v33, 2  ;;  %v580_v36 = vadd.f32 %v579_v34, %v578_v32 }
 0x221   : > { %v570_v37 = vadd.f32 %v569_v35, %v568_v33  ;;  %v581_v38 = vrot.slane %v580_v36, 2 }
 0x223   : > { %v571_v39 = vrot.slane %v570_v37, 1  ;;  %v582_v40 = vadd.f32 %v581_v38, %v580_v36 }
 0x225   : > { %v572_v42 = vadd.f32 %v571_v39, %v570_v37  ;;  %v583_v43 = vrot.slane %v582_v40, 1 }
 0x227   : > { %v573_v45 = vadd.f32 %v572_v42, %v565_v41  ;;  %v584_v46 = vadd.f32 %v583_v43, %v582_v40 }
 0x229   : > { %575 = vst.msk [vmem:[#allocation2] sm:$0x1] %vm382_vm0, %v573_v45  ;;  %v585_v47 = vadd.f32 %v584_v46, %v576_v44 }
 0x22b   : > { %586 = vst.msk [vmem:[#allocation3] sm:$0x1] %vm382_vm0, %v585_v47 }
 0x22c PF: > { %p1216_p6 = scmp.ne.s32.totalorder %s1541_s29, 1 }
 0x22d   : > { %v1559_v50 = vmov (!%p1216_p6), 0.0   ;;  %vm1560_vm4 = vmmov (!%p1216_p6), 0   ;;  %v1077_v54 = vld [vmem:[#allocation5] sm:$0x1] (!%p1216_p6)  ;;  %v1561_v55 = vmov (!%p1216_p6), 0   ;;  %v609_v59 = vlaneseq (!%p1216_p6)  ;;  %v623_v60 = vld [vmem:[%s1816_s6] sm:$0xff] (!%p1216_p6) }
 0x22e   : > { %590 = sbr.rel (%p1216_p6) target bundleno = 833 (0x341), region = 76  ;;  %1277 = vmatprep.subr.mxu0 (!%p1216_p6), %v1559_v50  ;;  %1282 = vmatprep.subr.mxu1 (!%p1216_p6), %v1559_v50  ;;  %vm624_vm5 = vcmask (!%p1216_p6), 523264   ;;  %v603_v63 = vld [vmem:[%s1814_s4] sm:$0x1] (!%p1216_p6)  ;;  %v593_v4 = vld [vmem:[#allocation4] sm:$0xff] (!%p1216_p6)  ;;  %vm1088_vm6 = vcmask (!%p1216_p6), 57344  }
 0x22f   : > { %1279 = vmatprep.mubr.msk.f32.mxu0 (!%p1216_p6), %vm1560_vm4, %v1559_v50  ;;  %1284 = vmatprep.mubr.msk.f32.mxu1 (!%p1216_p6), %vm1560_vm4, %v1559_v50  ;;  %v610_v61 = vshrl.u32 (!%p1216_p6), %v609_v59, 7  ;;  %v626_v62 = vsel (!%p1216_p6), %vm624_vm5, %v623_v60, 0  ;;  %v605_v5 = vld [vmem:[%s1815_s5] sm:$0x1] (!%p1216_p6) }
 0x230   : > { %v594_v48 = vld [vmem:[#allocation2] sm:$0x1] (!%p1216_p6)  ;;  %1402 = vset.pattern.permute.xlu0 (!%p1216_p6), %v1561_v55  ;;  %v697_v1 = vand.u32 (!%p1216_p6), 4294901760, %v626_v62 }
 0x231   : > { %v595_v51 = vmul.f32 (!%p1216_p6), 0.125, %v594_v48  ;;  %1080 = vperm.xlu0 (!%p1216_p6), %1402, %v1077_v54   ;;  %v1752_v0 = vsub.s32 (!%p1216_p6), 0, %v610_v61 }
 0x232   : > { %v596_v49 = vld [vmem:[#allocation3] sm:$0x1] (!%p1216_p6)  ;;  %v698_v8 = vsub.f32 (!%p1216_p6), %v626_v62, %v697_v1 }
 0x233   : > { %v597_v52 = vmul.f32 (!%p1216_p6), 0.125, %v596_v49  ;;  %v598_v53 = vmul.f32 (!%p1216_p6), %v595_v51, %v595_v51 }
 0x234   : > { %v699_v12 = vand.u32 (!%p1216_p6), 4294901760, %v698_v8 }
 0x235   : > { %v599_v56 = vsub.f32 %v597_v52, %v598_v53 }
 0x236   : > { %v700_v15 = vsub.f32 %v698_v8, %v699_v12 }
 0x237   : > { %v600_v57 = vmax.f32 %v599_v56, 0.0 }
 0x238   : > { %v701_v18 = vand.u32 4294901760, %v700_v15 }
 0x239   : > { %v601_v58 = vadd.f32 1e-05, %v600_v57 }
 0x23b   : > { %1403 = vrsqrt.f32 %v601_v58 }
 0x245   : > { %v1404_v2 = vpop.eup %1403 }
 0x246   : > { %v604_v3 = vmul.f32 %v1404_v2, %v603_v63 }
 0x248   : > { %v606_v6 = vmul.f32 %v604_v3, %v595_v51  ;;  %v612_v7 = vrot.slane %v604_v3, %v1752_v0 }
 0x24a   : > { %v607_v9 = vsub.f32 %v605_v5, %v606_v6  ;;  %v614_v10 = vmul.f32 %v612_v7, %v593_v4 }
 0x24c   : > { %v619_v11 = vrot.slane %v607_v9, %v1752_v0 }
 0x24e   : > { %v621_v13 = vadd.f32 %v619_v11, %v614_v10 }
 0x250   : > { %v622_v14 = vmax.f32 %v621_v13, 0.0 }
 0x252   : > { %v629_v16 = vsel %vm624_vm5, %v622_v14, 0 }
 0x253   : > { %v632_v17 = vand.u32 4294901760, %v629_v16 }
 0x255   : > { %1278 = vmatpush3.xpose.msra.mxu0 %v632_v17  ;;  %v709_v19 = vsub.f32 %v629_v16, %v632_v17 }
 0x256   : > { %1287 = vmatprep.subr.mxu0 %v1559_v50 }
 0x257   : > { %v710_v20 = vand.u32 4294901760, %v709_v19 }
 0x258   : > { %1280 = vmatmul.mubr.f32.vlgmr.msra.gmra.mrb[0].mxu0 %v701_v18 }
 0x259   : > { %v711_v21 = vsub.f32 %v709_v19, %v710_v20  ;;  %1288 = vmatpush3.xpose.msra.mxu0 %v709_v19  ;;  %1289 = vmatprep.mubr.msk.f32.mxu0 %vm1560_vm4, %v1559_v50 }
 0x25a   : > { %1297 = vmatprep.subr.mxu0 %v1559_v50 }
 0x25b   : > { %v712_v22 = vand.u32 4294901760, %v711_v21 }
 0x25c   : > { %1290 = vmatmul.mubr.f32.vlgmr.msra.gmra.mrb[2].mxu0 %v698_v8 }
 0x25d   : > { %1283 = vmatpush3.xpose.msra.mxu1 %v712_v22  ;;  %1298 = vmatpush3.xpose.msra.mxu0 %v710_v20 }
 0x25e   : > { %1292 = vmatprep.subr.mxu1 %v1559_v50  ;;  %1299 = vmatprep.mubr.msk.f32.mxu0 %vm1560_vm4, %v1559_v50 }
 0x260   : > { %1285 = vmatmul.mubr.f32.vlgmr.msra.gmra.mrb[0].mxu1 %v697_v1  ;;  %1300 = vmatmul.mubr.f32.vlgmr.msra.gmra.mrb[4].mxu0 %v697_v1 }
 0x261   : > { %1293 = vmatpush3.xpose.msra.mxu1 %v632_v17  ;;  %1294 = vmatprep.mubr.msk.f32.mxu1 %vm1560_vm4, %v1559_v50 }
 0x262   : > { %1302 = vmatprep.subr.mxu1 %v1559_v50 }
 0x264   : > { %1295 = vmatmul.mubr.f32.vlgmr.msra.gmra.mrb[2].mxu1 %v699_v12 }
 0x265   : > { %1303 = vmatpush3.xpose.msra.mxu1 %v632_v17  ;;  %1304 = vmatprep.mubr.msk.f32.mxu1 %vm1560_vm4, %v1559_v50 }
 0x268   : > { %1305 = vmatmul.mubr.f32.vlgmr.msra.gmra.mrb[4].mxu1 %v697_v1 }
 0x2b0   : > { %v1081_v34 = vpop.permute.xlu0 %1080 }
 0x2b1   : > { %v1086_v38 = vrot.slane %v1081_v34, %v1752_v0 }
 0x32b   : > { %v703_v23 = vpop.f32.mrb[0].mxu0 }
 0x32c   : > { %v1281_v24 = vpop.f32.mrb[1].mxu0 }
 0x32f   : > { %v853_v25 = vpop.f32.mrb[2].mxu0 }
 0x330   : > { %v1291_v26 = vpop.f32.mrb[3].mxu0 }
 0x333   : > { %v779_v27 = vpop.f32.mrb[0].mxu1  ;;  %v1001_v28 = vpop.f32.mrb[4].mxu0 }
 0x334   : > { %v780_v29 = vadd.f32 %v779_v27, %v703_v23  ;;  %v1286_v30 = vpop.f32.mrb[1].mxu1  ;;  %v1301_v31 = vpop.f32.mrb[5].mxu0 }
 0x336   : > { %v854_v32 = vadd.f32 %v853_v25, %v780_v29 }
 0x337   : > { %v927_v33 = vpop.f32.mrb[2].mxu1 }
 0x338   : > { %v928_v35 = vadd.f32 %v927_v33, %v854_v32  ;;  %v1296_v36 = vpop.f32.mrb[3].mxu1 }
 0x33a   : > { %v1002_v37 = vadd.f32 %v1001_v28, %v928_v35 }
 0x33b   : > { %v1073_v39 = vpop.f32.mrb[4].mxu1 }
 0x33c   : > { %v1074_v40 = vadd.f32 %v1073_v39, %v1002_v37  ;;  %v1306_v41 = vpop.f32.mrb[5].mxu1 }
 0x33e   : > { %v1087_v42 = vadd.f32 %v1086_v38, %v1074_v40 }
 0x340   : > { %1089 = vst.msk [vmem:[#allocation12] sm:$0x1] %vm1088_vm6, %v1087_v42 }
 0x341 PF: > { %p1775_p8 = scmp.eq.s32.totalorder %s1201_s7, 1  ;;  %s1562_s16 = smov [#allocation12]  }
 0x342   : > { %s1104_s23 = sshll.u32 %s1562_s16, 4  ;;  %s1105_s23 = int_to_ptr.vmem [resolvable:$true] %s1104_s23 }
 0x343   : > { %s1489_s24 = scalar_lea.vmem %s1105_s23, 16  ;;  %s1495_s18 = scalar_lea.vmem %s1105_s23, 32 }
 0x344   : > { %p1490_p11 = scmp.ne.s32.totalorder %s1105_s23, %s1489_s24  ;;  %p1496_p0 = scmp.lt.s32.totalorder %s1105_s23, %s1105_s23 }
 0x345   : > { %p1497_p1 = scmp.lt.s32.totalorder %s1495_s18, %s1489_s24 }
 0x346   : > { %p1491_p12 = pnand %p1490_p11, %p1775_p8 }
 0x347   : > { %p1498_p2 = por %p1497_p1, %p1496_p0 }
 0x348   : > { %p1492_p13 = pneg %p1491_p12 }
 0x34a   : > { %p1499_p5 = pnand %p1498_p2, %p1492_p13 }
 0x34c   : > { %1502 = shalt.err (!%p1499_p5)
}
 0x34d   : > { %s1503_s28 = scalar_lea.hbm %s1818_s8, 16 }
 0x34e   : > { %p1504_p3 = scmp.ne.s32.totalorder %s1818_s8, %s1503_s28  ;;  %p1509_p9 = scmp.lt.u32.totalorder %s1503_s28, %s1818_s8 }
 0x350   : > { %p1505_p4 = pnand %p1504_p3, %p1775_p8 }
 0x352   : > { %p1506_p10 = pneg %p1505_p4 }
 0x354   : > { %p1511_p7 = pnand %p1509_p9, %p1506_p10 }
 0x356   : > { %1514 = shalt.err (!%p1511_p7)
}
 0x357   : > { %1338 = dma.vmem_to_hbm [thread:$0]  (%p1775_p8), %s1105_s23, 16, %s1818_s8, [#allocation8]  }
 0x358 PF: > { %p1365_p6 = scmp.eq.s32.totalorder %s1202_s10, 1  ;;  %p1831_p11 = scmp.ge.s32.totalorder %s1549_s9, 2 }
 0x35a   : > { %p1353_p12 = pnand %p1365_p6, %p1831_p11 }
 0x35c   : > { %1536 = dma.done.wait (!%p1353_p12), [#allocation8], 16  }
 0x35d   : > { %1538 = vsyncadd (!%p1353_p12), [#allocation8], 4294967280  ;;  %s27_s9 = sadd.s32 1, %s1549_s9   ;;  %s1832_s29 = smov %s1545_s30 }
 0x35e   : > { %p24_p13 = scmp.ge.s32.totalorder %s27_s9, 4   ;;  %s1833_s30 = smov %s1835_s11 }
 0x360   :  { %26 = sbr.rel (!%p24_p13) target bundleno = 9 (0x9), region = 119 }
 0x367   :  { %1121 = vsyncpa [#allocation7], 1 }
 0x368   :  { %1123 = vsyncpa [#allocation7 + $0x1], 1 }
 0x369   :  { %1124 = vsyncpa [#allocation10], 1 }
 0x36a   :  { %1125 = vsyncpa [#allocation8], 1 }
 0x36b   :  { %1127 = vsyncpa [#allocation8 + $0x1], 1 }

</bundles_post_ra>
